<compile_context>
chip_gen: v6e
topology: v6e:2x2x1
jax: 0.10.0
libtpu: 0.0.40
codegen_flags: <defaults>
</compile_context>

<pallas_src>
import jax
import jax.numpy as jnp
from jax.experimental import pallas as pl
from jax.experimental.pallas import tpu as pltpu


def _round_up(n, m):
    return ((n + m - 1) // m) * m


def value_net_kernel(x_ref, w1_ref, b1_ref, w2_ref, b2_ref, wv_ref, bv_ref, o_ref):
    """Fused MLP forward for one batch tile (weights resident in VMEM)."""
    # fc1 + relu (MXU, f32 accumulate)
    h1 = jnp.dot(x_ref[...], w1_ref[...], preferred_element_type=jnp.float32)
    h1 = jnp.maximum(h1 + b1_ref[...], 0.0)
    # fc2 + relu
    h2 = jnp.dot(h1, w2_ref[...], preferred_element_type=jnp.float32)
    h2 = jnp.maximum(h2 + b2_ref[...], 0.0)
    # Value head: an N=1 MXU matmul wastes a push + serial pop for one column,
    # so use VPU multiply + lane (XLU) reduction instead.
    v = jnp.sum(h2 * wv_ref[...], axis=-1, keepdims=True) + bv_ref[...]   # (tile, 1)
    # Lane-dense store: broadcast across the 128-lane axis (unmasked vst);
    # the wrapper slices column 0.
    o_ref[...] = jnp.broadcast_to(v, o_ref.shape)


def value_network_forward(x, params, *, batch_tile=256):
    w1, b1, w2, b2, wv, bv = params
    B, in_dim = x.shape
    fc1 = w1.shape[1]
    fc2 = w2.shape[1]
    wv_row = wv.reshape(1, fc2)   # value-head weights as a row for the VPU path

    # Batch tile: multiple of 8 (sublanes), capped at `batch_tile` rows.
    tb = min(batch_tile, _round_up(max(B, 1), 8))
    tb = _round_up(tb, 8)
    b_pad = _round_up(B, tb)
    if b_pad != B:
        x = jnp.pad(x, ((0, b_pad - B), (0, 0)))
    grid = (b_pad // tb,)

    # Weights/biases: same block (0, 0) every step -> kept resident, no re-DMA.
    const = lambda shape: pl.BlockSpec(shape, lambda i: (0,) * len(shape))

    out = pl.pallas_call(
        value_net_kernel,
        out_shape=jax.ShapeDtypeStruct((b_pad, 128), jnp.float32),
        grid_spec=pltpu.PrefetchScalarGridSpec(
            num_scalar_prefetch=0,
            grid=grid,
            in_specs=[
                pl.BlockSpec((tb, in_dim), lambda i: (i, 0)),   # x: tiled over batch
                const(w1.shape), const(b1.shape),
                const(w2.shape), const(b2.shape),
                const(wv_row.shape), const(bv.shape),
            ],
            out_specs=pl.BlockSpec((tb, 128), lambda i: (i, 0)),
        ),
        compiler_params=pltpu.CompilerParams(
            # Batch axis is embarrassingly parallel -> shards across v7x's 2 TCs.
            dimension_semantics=("parallel",),
        ),
    )(x, w1, b1, w2, b2, wv_row, bv)

    return out[:B, :1]


def init_params(key, input_dim, fc1_dims, fc2_dims):
    """Deterministic init mimicking nn.Linear default (U[-1/sqrt(fan_in), 1/sqrt(fan_in)])."""
    ks = jax.random.split(key, 6)

    def linear(kw, kb, fan_in, fan_out):
        bound = 1.0 / jnp.sqrt(fan_in)
        w = jax.random.uniform(kw, (fan_in, fan_out), jnp.float32, -bound, bound)
        b = jax.random.uniform(kb, (1, fan_out), jnp.float32, -bound, bound)
        return w, b

    w1, b1 = linear(ks[0], ks[1], input_dim, fc1_dims)
    w2, b2 = linear(ks[2], ks[3], fc1_dims, fc2_dims)
    wv, bv = linear(ks[4], ks[5], fc2_dims, 1)
    return (w1, b1, w2, b2, wv, bv)


def _reference(x, params):
    w1, b1, w2, b2, wv, bv = params
    h1 = jnp.maximum(x @ w1 + b1, 0.0)
    h2 = jnp.maximum(h1 @ w2 + b2, 0.0)
    # Same math as h2 @ wv + bv; computed elementwise so it follows the same
    # exact-f32 path as the kernel's VPU value head.
    return jnp.sum(h2 * wv.reshape(1, -1), axis=-1, keepdims=True) + bv


if __name__ == "__main__":
    # Small shapes consistent with the module: input_dims=(16,), fc1=32, fc2=32, batch=8
    batch, input_dim, fc1_dims, fc2_dims = 8, 16, 32, 32

    key = jax.random.PRNGKey(0)
    k_x, k_p, k_x2 = jax.random.split(key, 3)
    x = jax.random.normal(k_x, (batch, input_dim), jnp.float32)
    params = init_params(k_p, input_dim, fc1_dims, fc2_dims)

    v = value_network_forward(x, params)
    jax.block_until_ready(v)
    v_ref = _reference(x, params)
    assert v.shape == (batch, 1)
    assert jnp.allclose(v, v_ref, atol=1e-4, rtol=1e-3)

    # Exercise the tiled + padded path (grid > 1, batch not a multiple of the tile).
    x_big = jax.random.normal(k_x2, (300, input_dim), jnp.float32)
    v_big = value_network_forward(x_big, params)
    jax.block_until_ready(v_big)
    v_big_ref = _reference(x_big, params)
    assert v_big.shape == (300, 1)
    assert jnp.allclose(v_big, v_big_ref, atol=1e-4, rtol=1e-3)

    # TODO(synk): optimizer/checkpoint I/O from the PyTorch module is training state,
    # not part of the forward pass, and is intentionally not implemented.
    print("KERNEL_OK")
</pallas_src>

<mosaic_0001>
module attributes {stable_mosaic.version = 11 : i64} {
  func.func @value_net_kernel(%arg0: i32, %arg1: memref<8x16xf32, #tpu.memory_space<vmem>>, %arg2: memref<16x32xf32, #tpu.memory_space<vmem>>, %arg3: memref<1x32xf32, #tpu.memory_space<vmem>>, %arg4: memref<32x32xf32, #tpu.memory_space<vmem>>, %arg5: memref<1x32xf32, #tpu.memory_space<vmem>>, %arg6: memref<1x32xf32, #tpu.memory_space<vmem>>, %arg7: memref<1x1xf32, #tpu.memory_space<vmem>>, %arg8: memref<8x128xf32, #tpu.memory_space<vmem>>) attributes {dimension_semantics = [#tpu.dimension_semantics<parallel>], iteration_bounds = array<i64: 1>, scalar_prefetch = 0 : i64, scratch_operands = 0 : i64, tpu.core_type = #tpu.core_type<tc>, window_params = [{transform_indices = @transform_0, window_bounds = array<i64: 8, 16>}, {pipeline_mode = #tpu.pipeline_mode<synchronous>, transform_indices = @transform_1, window_bounds = array<i64: 16, 32>}, {pipeline_mode = #tpu.pipeline_mode<synchronous>, transform_indices = @transform_2, window_bounds = array<i64: 1, 32>}, {pipeline_mode = #tpu.pipeline_mode<synchronous>, transform_indices = @transform_3, window_bounds = array<i64: 32, 32>}, {pipeline_mode = #tpu.pipeline_mode<synchronous>, transform_indices = @transform_4, window_bounds = array<i64: 1, 32>}, {pipeline_mode = #tpu.pipeline_mode<synchronous>, transform_indices = @transform_5, window_bounds = array<i64: 1, 32>}, {pipeline_mode = #tpu.pipeline_mode<synchronous>, transform_indices = @transform_6, window_bounds = array<i64: 1, 1>}, {transform_indices = @transform_7, window_bounds = array<i64: 8, 128>}]} {
    %c0 = arith.constant 0 : index
    %c0_0 = arith.constant 0 : index
    %0 = vector.load %arg1[%c0, %c0_0] : memref<8x16xf32, #tpu.memory_space<vmem>>, vector<8x16xf32>
    %c0_1 = arith.constant 0 : index
    %c0_2 = arith.constant 0 : index
    %1 = vector.load %arg2[%c0_1, %c0_2] : memref<16x32xf32, #tpu.memory_space<vmem>>, vector<16x32xf32>
    %cst = arith.constant dense<0.000000e+00> : vector<8x32xf32>
    %2 = tpu.matmul %0, %1, %cst {dimension_numbers = #tpu.dot_dimension_numbers<[1], [0], [0], [1], [0, 0, 1, 1], [], []>} : vector<8x16xf32>, vector<16x32xf32>, vector<8x32xf32> -> vector<8x32xf32>
    %c0_3 = arith.constant 0 : index
    %c0_4 = arith.constant 0 : index
    %3 = vector.load %arg3[%c0_3, %c0_4] : memref<1x32xf32, #tpu.memory_space<vmem>>, vector<1x32xf32>
    %4 = vector.broadcast %3 : vector<1x32xf32> to vector<8x32xf32>
    %5 = arith.addf %2, %4 : vector<8x32xf32>
    %cst_5 = arith.constant 0.000000e+00 : f32
    %6 = vector.broadcast %cst_5 : f32 to vector<8x32xf32>
    %7 = arith.maximumf %5, %6 : vector<8x32xf32>
    %c0_6 = arith.constant 0 : index
    %c0_7 = arith.constant 0 : index
    %8 = vector.load %arg4[%c0_6, %c0_7] : memref<32x32xf32, #tpu.memory_space<vmem>>, vector<32x32xf32>
    %cst_8 = arith.constant dense<0.000000e+00> : vector<8x32xf32>
    %9 = tpu.matmul %7, %8, %cst_8 {dimension_numbers = #tpu.dot_dimension_numbers<[1], [0], [0], [1], [0, 0, 1, 1], [], []>} : vector<8x32xf32>, vector<32x32xf32>, vector<8x32xf32> -> vector<8x32xf32>
    %c0_9 = arith.constant 0 : index
    %c0_10 = arith.constant 0 : index
    %10 = vector.load %arg5[%c0_9, %c0_10] : memref<1x32xf32, #tpu.memory_space<vmem>>, vector<1x32xf32>
    %11 = vector.broadcast %10 : vector<1x32xf32> to vector<8x32xf32>
    %12 = arith.addf %9, %11 : vector<8x32xf32>
    %cst_11 = arith.constant 0.000000e+00 : f32
    %13 = vector.broadcast %cst_11 : f32 to vector<8x32xf32>
    %14 = arith.maximumf %12, %13 : vector<8x32xf32>
    %c0_12 = arith.constant 0 : index
    %c0_13 = arith.constant 0 : index
    %15 = vector.load %arg6[%c0_12, %c0_13] : memref<1x32xf32, #tpu.memory_space<vmem>>, vector<1x32xf32>
    %16 = vector.broadcast %15 : vector<1x32xf32> to vector<8x32xf32>
    %17 = arith.mulf %14, %16 : vector<8x32xf32>
    %cst_14 = arith.constant dense<0.000000e+00> : vector<8xf32>
    %18 = vector.multi_reduction <add>, %17, %cst_14 [1] : vector<8x32xf32> to vector<8xf32>
    %19 = vector.shape_cast %18 : vector<8xf32> to vector<8x1xf32>
    %c0_15 = arith.constant 0 : index
    %c0_16 = arith.constant 0 : index
    %20 = vector.load %arg7[%c0_15, %c0_16] : memref<1x1xf32, #tpu.memory_space<vmem>>, vector<1x1xf32>
    %21 = vector.broadcast %20 : vector<1x1xf32> to vector<8x1xf32>
    %22 = arith.addf %19, %21 : vector<8x1xf32>
    %23 = vector.shape_cast %22 : vector<8x1xf32> to vector<8x1xf32>
    %24 = vector.broadcast %23 : vector<8x1xf32> to vector<8x128xf32>
    %c0_17 = arith.constant 0 : index
    %c0_18 = arith.constant 0 : index
    %25 = vector.load %arg8[%c0_17, %c0_18] : memref<8x128xf32, #tpu.memory_space<vmem>>, vector<8x128xf32>
    tpu.vector_store %arg8[%c0_17, %c0_18], %24 {strides = array<i32>} : memref<8x128xf32, #tpu.memory_space<vmem>>, vector<8x128xf32>,
    return
  }
  func.func @transform_0(%arg0: i32) -> (i32, i32) {
    %c0_i32 = arith.constant 0 : i32
    %c0_i32_0 = arith.constant 0 : i32
    return %arg0, %c0_i32 : i32, i32
  }
  func.func @transform_1(%arg0: i32) -> (i32, i32) {
    %c0_i32 = arith.constant 0 : i32
    %c0_i32_0 = arith.constant 0 : i32
    %c0_i32_1 = arith.constant 0 : i32
    return %c0_i32, %c0_i32_0 : i32, i32
  }
  func.func @transform_2(%arg0: i32) -> (i32, i32) {
    %c0_i32 = arith.constant 0 : i32
    %c0_i32_0 = arith.constant 0 : i32
    %c0_i32_1 = arith.constant 0 : i32
    return %c0_i32, %c0_i32_0 : i32, i32
  }
  func.func @transform_3(%arg0: i32) -> (i32, i32) {
    %c0_i32 = arith.constant 0 : i32
    %c0_i32_0 = arith.constant 0 : i32
    %c0_i32_1 = arith.constant 0 : i32
    return %c0_i32, %c0_i32_0 : i32, i32
  }
  func.func @transform_4(%arg0: i32) -> (i32, i32) {
    %c0_i32 = arith.constant 0 : i32
    %c0_i32_0 = arith.constant 0 : i32
    %c0_i32_1 = arith.constant 0 : i32
    return %c0_i32, %c0_i32_0 : i32, i32
  }
  func.func @transform_5(%arg0: i32) -> (i32, i32) {
    %c0_i32 = arith.constant 0 : i32
    %c0_i32_0 = arith.constant 0 : i32
    %c0_i32_1 = arith.constant 0 : i32
    return %c0_i32, %c0_i32_0 : i32, i32
  }
  func.func @transform_6(%arg0: i32) -> (i32, i32) {
    %c0_i32 = arith.constant 0 : i32
    %c0_i32_0 = arith.constant 0 : i32
    %c0_i32_1 = arith.constant 0 : i32
    return %c0_i32, %c0_i32_0 : i32, i32
  }
  func.func @transform_7(%arg0: i32) -> (i32, i32) {
    %c0_i32 = arith.constant 0 : i32
    %c0_i32_0 = arith.constant 0 : i32
    return %arg0, %c0_i32 : i32, i32
  }
}

</mosaic_0001>

<bundles_post_ra>
// kernel: tpu_custom_call.1
= control target key start
LH: loop header
LB: loop body
LE: loop exit
PB: predicated region body
PF: predicated region fallthrough
CT: control target
= control target key end

     0   :  { %s481_s0 = inlined_call_operand.hbm [shape: f32[8,16], index: 0, kind: input, shape index: {}]   ;;  %s482_s1 = inlined_call_operand.hbm [shape: f32[16,32], index: 1, kind: input, shape index: {}]   ;;  %s483_s2 = inlined_call_operand.vmem [shape: f32[1,32], index: 2, kind: input, shape index: {}]   ;;  %s484_s3 = inlined_call_operand.hbm [shape: f32[32,32], index: 3, kind: input, shape index: {}]   ;;  %s485_s4 = inlined_call_operand.vmem [shape: f32[1,32], index: 4, kind: input, shape index: {}]   ;;  %s486_s5 = inlined_call_operand.vmem [shape: f32[1,32], index: 5, kind: input, shape index: {}]   ;;  %s487_s6 = inlined_call_operand.<no memory space> [shape: f32[1,1], index: 6, kind: input, shape index: {}]   ;;  %s488_s7 = inlined_call_operand.hbm [shape: f32[8,128], index: 7, kind: output, shape index: {}]  }
   0x1   :  { %v12_v0 = vstv %s487_s6 }
   0x2   :  { %13 = vst [vmem:[#allocation2] sm:$0x1] %v12_v0 }
   0x3   :  { %14 = vsyncpa [#allocation4], 0 }
   0x4   :  { %15 = vsyncpa [#allocation7], 0 }
   0x5   :  { %16 = vsyncpa [#allocation5], 0  ;;  %s408_s26 = smov [#allocation6]  }
   0x6   :  { %s32_s27 = sshll.u32 %s408_s26, 4  ;;  %s33_s27 = int_to_ptr.vmem [resolvable:$true] %s32_s27 }
   0x7   :  { %s330_s28 = scalar_lea.vmem %s33_s27, 256  ;;  %p335_p1 = scmp.lt.s32.totalorder %s33_s27, %s33_s27 }
   0x8   :  { %p331_p0 = scmp.ne.s32.totalorder %s33_s27, %s330_s28  ;;  %p336_p2 = scmp.lt.s32.totalorder %s330_s28, %s330_s28 }
   0xa   :  { %p337_p3 = por %p336_p2, %p335_p1 }
   0xc   :  { %p338_p4 = pnand %p337_p3, %p331_p0 }
   0xe   :  { %341 = shalt.err (!%p338_p4)
}
   0xf   :  { %s409_s29 = smov 128   ;;  %s410_s30 = smov 8  }
  0x10   :  { %38 = dma.hbm_to_vmem [thread:$0]  %s482_s1, 256, %s33_s27, [#allocation7], %s409_s29, %s409_s29, %s410_s30  }
  0x11   :  { %s411_s6 = smov [#allocation3]   ;;  %s412_s11 = smov [#allocation8]  }
  0x12   :  { %s23_s10 = sshll.u32 %s411_s6, 4  ;;  %s46_s12 = sshll.u32 %s412_s11, 4  ;;  %s24_s10 = int_to_ptr.vmem [resolvable:$true] %s23_s10  ;;  %s47_s12 = int_to_ptr.vmem [resolvable:$true] %s46_s12 }
  0x13   :  { %s350_s13 = scalar_lea.vmem %s24_s10, 128  ;;  %p355_p6 = scmp.lt.s32.totalorder %s24_s10, %s24_s10 }
  0x14   :  { %p351_p5 = scmp.ne.s32.totalorder %s24_s10, %s350_s13  ;;  %p356_p7 = scmp.lt.s32.totalorder %s350_s13, %s350_s13 }
  0x16   :  { %p357_p8 = por %p356_p7, %p355_p6 }
  0x18   :  { %p358_p9 = pnand %p357_p8, %p351_p5 }
  0x1a   :  { %361 = shalt.err (!%p358_p9)
}
  0x1b   :  { %26 = dma.hbm_to_vmem [thread:$0]  %s481_s0, 128, %s24_s10, [#allocation4]  }
  0x1c   :  { %s370_s16 = scalar_lea.vmem %s47_s12, 512  ;;  %p375_p11 = scmp.lt.s32.totalorder %s47_s12, %s47_s12 }
  0x1d   :  { %p371_p10 = scmp.ne.s32.totalorder %s47_s12, %s370_s16  ;;  %p376_p12 = scmp.lt.s32.totalorder %s370_s16, %s370_s16 }
  0x1f   :  { %p377_p13 = por %p376_p12, %p375_p11 }
  0x21   :  { %p378_p0 = pnand %p377_p13, %p371_p10 }
  0x23   :  { %381 = shalt.err (!%p378_p0)
}
  0x24   :  { %52 = dma.hbm_to_vmem [thread:$0]  %s484_s3, 512, %s47_s12, [#allocation7], %s409_s29, %s409_s29, %s410_s30  }
  0x25   :  { %402 = dma.done.wait [#allocation4], 128  }
  0x26   :  { %403 = vsyncadd [#allocation4], 4294967168 }
  0x27   :  { %404 = dma.done.wait [#allocation7], 768  }
  0x28   :  { %405 = vsyncadd [#allocation7], 4294966528  ;;  %v413_v1 = vmov 0.0   ;;  %vm414_vm0 = vmmov 0   ;;  %v70_v2 = vld [vmem:[#allocation6 + $0x8] sm:$0xff]  ;;  %v69_v3 = vld [vmem:[#allocation6] sm:$0xff] }
  0x29   :  { %294 = vmatprep.subr.mxu0 %v413_v1  ;;  %298 = vmatprep.mubr.msk.f32.mxu0 %vm414_vm0, %v413_v1  ;;  %v68_v4 = vld [vmem:[#allocation3] sm:$0xff]  ;;  %vm78_vm1 = vcmask 130048   ;;  %v156_v5 = vld [vmem:[#allocation8 + $0x18] sm:$0xff]  ;;  %v155_v6 = vld [vmem:[#allocation8 + $0x10] sm:$0xff]  ;;  %vm164_vm2 = vcmask 261120   ;;  %v415_v22 = vmov 0  }
  0x2a   :  { %301 = vmatprep.subr.mxu1 %v413_v1  ;;  %309 = vmatprep.mubr.msk.f32.mxu1 %vm414_vm0, %v413_v1  ;;  %v154_v7 = vld [vmem:[#allocation8 + $0x8] sm:$0xff]  ;;  %v153_v8 = vld [vmem:[#allocation8] sm:$0xff] }
  0x2b   :  { %295 = vmatpush3.msra.mxu0 %v70_v2  ;;  %302 = vmatpush3.msra.mxu1 %v156_v5  ;;  %v280_v9 = vld [vmem:[%s483_s2] ss:$0 sm:$0xff]  ;;  %s416_s2 = smov [#allocation9]  }
  0x2c   :  { %296 = vmatprep.subr.mxu0 %v413_v1  ;;  %303 = vmatprep.subr.mxu1 %v413_v1  ;;  %v282_v14 = vld [vmem:[%s485_s4] ss:$0 sm:$0xff]  ;;  %s270_s22 = sshll.u32 %s416_s2, 4  ;;  %s271_s22 = int_to_ptr.vmem [resolvable:$true] %s270_s22 }
  0x2d   :  { %297 = vmatpush3.msra.mxu0 %v69_v3  ;;  %304 = vmatpush3.msra.mxu1 %v155_v6  ;;  %v284_v18 = vld [vmem:[%s486_s5] ss:$0 sm:$0xff]  ;;  %s382_s4 = scalar_lea.vmem %s271_s22, 128  ;;  %p387_p2 = scmp.lt.s32.totalorder %s271_s22, %s271_s22 }
  0x2e   :  { %299 = vmatmul.mubr.msk.f32.vlgmr.msra.gmra.mxu0 %vm78_vm1, %v68_v4  ;;  %305 = vmatprep.subr.mxu1 %v413_v1  ;;  %v285_v23 = vld [vmem:[#allocation2] ss:$0 sm:$0xff]  ;;  %p383_p1 = scmp.ne.s32.totalorder %s271_s22, %s382_s4  ;;  %p388_p3 = scmp.lt.s32.totalorder %s382_s4, %s382_s4 }
  0x2f   :  { %306 = vmatpush3.msra.mxu1 %v154_v7  ;;  %321 = vset.pattern.permute.xlu0 %v415_v22 }
  0x30   :  { %307 = vmatprep.subr.mxu1 %v413_v1  ;;  %p389_p4 = por %p388_p3, %p387_p2 }
  0x31   :  { %308 = vmatpush3.msra.mxu1 %v153_v8 }
  0x32   :  { %p390_p5 = pnand %p389_p4, %p383_p1 }
  0xee   :  { %v148_v10 = vpop.f32.mrf.mxu0 }
  0xef   :  { %v149_v11 = vadd.f32 %v280_v9, %v148_v10 }
  0xf0   :  { %v300_v12 = vpop.f32.mrf.mxu0 }
  0xf1   :  { %v152_v13 = vmax.f32 %v149_v11, 0.0 }
  0xf3   :  { %310 = vmatmul.mubr.msk.f32.vlgmr.msra.gmra.mxu1 %vm164_vm2, %v152_v13 }
 0x1b3   :  { %v234_v15 = vpop.f32.mrf.mxu1 }
 0x1b4   :  { %v235_v16 = vadd.f32 %v282_v14, %v234_v15 }
 0x1b5   :  { %v311_v17 = vpop.f32.mrf.mxu1 }
 0x1b6   :  { %v238_v19 = vmax.f32 %v235_v16, 0.0 }
 0x1b8   :  { %v246_v20 = vmul.f32 %v284_v18, %v238_v19 }
 0x1ba   :  { %v247_v21 = vsel %vm164_vm2, %v246_v20, 0.0 }
 0x1bb   :  { %248 = vadd.xlane.f32.xlu0 %v247_v21 }
 0x244   :  { %v249_v24 = vpop.xlane.xlu0 %248 }
 0x245   :  { %v257_v25 = vadd.f32 %v285_v23, %v249_v24 }
 0x247   :  { %260 = vperm.xlu0 %321, %v257_v25  }
 0x2c2   :  { %v261_v26 = vpop.permute.xlu0 %260 }
 0x2c3   :  { %263 = vst [vmem:[#allocation9] sm:$0xff] %v261_v26 }
 0x2c4   :  { %393 = shalt.err (!%p390_p5)
}
 0x2c5   :  { %273 = dma.vmem_to_hbm [thread:$0]  %s271_s22, 128, %s488_s7, [#allocation5]  }
 0x2c6   :  { %406 = dma.done.wait [#allocation5], 128  }
 0x2c7   :  { %407 = vsyncadd [#allocation5], 4294967168 }
 0x2c8   :  { %277 = vsyncpa [#allocation4], 1 }
 0x2c9   :  { %278 = vsyncpa [#allocation7], 1 }
 0x2ca   :  { %279 = vsyncpa [#allocation5], 1 }

</bundles_post_ra>
